<compile_context>
chip_gen: v7x
topology: tpu7x:2x2x1
jax: 0.10.0
libtpu: 0.0.40
codegen_flags: <defaults>
</compile_context>

<pallas_src>
import jax
import jax.numpy as jnp
from jax.experimental import pallas as pl
from jax.experimental.pallas import tpu as pltpu

SELU_ALPHA = 1.6732632423543772
SELU_SCALE = 1.0507009873554804

_VMEM_LIMIT_BYTES = 32 * 1024 * 1024    # scoped-VMEM limit safe on v5e/v6e/v7x
_TILE_BUDGET_BYTES = 16 * 1024 * 1024   # per-grid-step working-set target
_MAX_BATCH_TILE = 4096                  # rows; enough to amortize per-step cost


def _round_up(x, m):
    return (x + m - 1) // m * m


def _cdiv(a, b):
    return -(-a // b)


def _selu_unscaled(x):
    # SELU with the leading scale folded into the *next* layer's weights.
    return jnp.where(x > 0, x, SELU_ALPHA * (jnp.exp(x) - 1.0))


def _make_kernel(precision):
    def kernel(nf_ref, w1_ref, b1_ref, w2_ref, b2_ref, wh_ref, bh_ref, out_ref):
        # Node-axis reduction (PyTorch .sum(dim=1)); accumulate in f32 even if
        # the HBM stream is bf16.
        x = nf_ref[...].astype(jnp.float32).sum(axis=1)              # (TB, D)

        # readout: Linear -> SELU -> Linear -> SELU (SELU scale folded into
        # w2 / w_head at prep time; hidden dim zero-padded to x128 lanes).
        h = jnp.dot(x, w1_ref[...], preferred_element_type=jnp.float32,
                    precision=precision) + b1_ref[...]
        h = _selu_unscaled(h)
        h = jnp.dot(h, w2_ref[...], preferred_element_type=jnp.float32,
                    precision=precision) + b2_ref[...]
        h = _selu_unscaled(h)

        # Fused policy+value head, zero-padded to a lane-dense (x128) width.
        out_ref[...] = (jnp.dot(h, wh_ref[...], preferred_element_type=jnp.float32,
                                precision=precision)
                        + bh_ref[...]).astype(out_ref.dtype)
    return kernel


def prepare_kernel_params(params):
    """Fold SELU scale into consumer weights, fuse the two heads, and zero-pad
    the hidden / output dims to 128-lane multiples.  Call once; reuse.
    """
    d = params["w1"].shape[0]
    a_dim = params["w_policy"].shape[1]
    out_dim = a_dim + 1
    h_pad = _round_up(d, 128)
    out_pad = _round_up(out_dim, 128)
    pad_h = h_pad - d

    w1 = jnp.pad(params["w1"], ((0, 0), (0, pad_h)))                   # (D, Hp)
    b1 = jnp.pad(params["b1"], ((0, 0), (0, pad_h)))                   # (1, Hp)
    w2 = jnp.pad(params["w2"] * SELU_SCALE, ((0, pad_h), (0, pad_h)))  # (Hp, Hp)
    b2 = jnp.pad(params["b2"], ((0, 0), (0, pad_h)))                   # (1, Hp)

    w_head = jnp.concatenate([params["w_policy"], params["w_value"]], axis=1)
    b_head = jnp.concatenate([params["b_policy"], params["b_value"]], axis=1)
    # Zero padding => padded hidden/output columns stay exactly 0 end-to-end
    # (unscaled SELU(0) == 0) and padded output columns are sliced away.
    w_head = jnp.pad(w_head * SELU_SCALE, ((0, pad_h), (0, out_pad - out_dim)))
    b_head = jnp.pad(b_head, ((0, 0), (0, out_pad - out_dim)))

    return dict(w1=w1, b1=b1, w2=w2, b2=b2, w_head=w_head, b_head=b_head)


def _choose_batch_tile(batch, n_nodes, d, h_pad, out_pad, in_bytes):
    """Batch tile from a VMEM budget, with >=2 (even) grid steps once the batch
    is non-trivial (so both v7x TensorCores get work) and padding bounded by
    one sublane group."""
    batch = max(int(batch), 1)
    # Per-row working set: double-buffered input + output tiles plus ~6 f32
    # hidden-width temporaries (node-sum, pre/post activations, exp temp).
    per_row = (2 * n_nodes * d * in_bytes) + (2 * out_pad * 4) + (6 * h_pad * 4)
    cap = max(8, min(_MAX_BATCH_TILE, (_TILE_BUDGET_BYTES // per_row) // 8 * 8))

    steps = _cdiv(batch, cap)
    if batch > 8:
        steps = max(steps, 2)              # shard batch across 2 TCs on v7x
        if steps > 2 and steps % 2:
            steps += 1                     # balanced (even) split across 2 TCs
    return _round_up(_cdiv(batch, steps), 8)


def baseline_mlp_fused_forward(node_features, kparams, action_space_dim, *,
                               precision=None, input_dtype=None):
    """One pallas_call computing BOTH heads on a lane-dense fused output.

    precision:   matmul precision for the three dots (None => DEFAULT).
    input_dtype: optional narrower dtype (e.g. jnp.bfloat16) for the dominant
                 (B, N, D) HBM stream; accumulation stays f32 in-kernel.
    Returns (policy_logits (B, A), v_value (B, 1)).
    """
    B, N, D = node_features.shape
    h_pad = kparams["w1"].shape[1]
    out_pad = kparams["w_head"].shape[1]

    nf = node_features
    if input_dtype is not None and nf.dtype != input_dtype:
        nf = nf.astype(input_dtype)
    in_bytes = jnp.dtype(nf.dtype).itemsize

    tb = _choose_batch_tile(B, N, D, h_pad, out_pad, in_bytes)
    b_pad = _round_up(max(B, 1), tb)
    if b_pad != B:
        nf = jnp.pad(nf, ((0, b_pad - B), (0, 0), (0, 0)))

    # Constant block index => weights/biases are DMA'd once per pallas_call and
    # stay VMEM-resident across all batch tiles.  (They are tiny here; if the
    # hidden dim ever grows large, add pipeline_mode=pl.Buffered(1) on these
    # specs to drop the second buffer.)
    const = lambda i: (0, 0)

    out = pl.pallas_call(
        _make_kernel(precision),
        out_shape=jax.ShapeDtypeStruct((b_pad, out_pad), jnp.float32),
        grid=(b_pad // tb,),
        in_specs=[
            pl.BlockSpec((tb, N, D), lambda i: (i, 0, 0)),   # node_features tile
            pl.BlockSpec((D, h_pad), const),                 # w1 (hidden padded)
            pl.BlockSpec((1, h_pad), const),                 # b1
            pl.BlockSpec((h_pad, h_pad), const),             # w2 (scale folded)
            pl.BlockSpec((1, h_pad), const),                 # b2
            pl.BlockSpec((h_pad, out_pad), const),           # fused head W
            pl.BlockSpec((1, out_pad), const),               # fused head b
        ],
        out_specs=pl.BlockSpec((tb, out_pad), lambda i: (i, 0)),
        compiler_params=pltpu.CompilerParams(
            dimension_semantics=("parallel",),
            vmem_limit_bytes=_VMEM_LIMIT_BYTES),
    )(nf, kparams["w1"], kparams["b1"], kparams["w2"], kparams["b2"],
      kparams["w_head"], kparams["b_head"])

    policy_logits = out[:B, :action_space_dim]
    v_value = out[:B, action_space_dim:action_space_dim + 1]
    return policy_logits, v_value


def baseline_mlp_forward(node_features, edge_features, adjacency_matrix,
                         params, nn_type, *, precision=None, input_dtype=None):
    """Mirrors BaselineMLP.forward; edge_features/adjacency_matrix are unused
    (they are unused by the PyTorch module too)."""
    del edge_features, adjacency_matrix
    a_dim = params["w_policy"].shape[1]
    kparams = prepare_kernel_params(params)
    policy, value = baseline_mlp_fused_forward(
        node_features, kparams, a_dim, precision=precision, input_dtype=input_dtype)
    if nn_type == "policy":
        return policy
    if nn_type == "value":
        return value
    raise ValueError(nn_type)


def init_params(key, node_feature_dim, action_space_dim):
    """Deterministic parameter init (PyTorch-Linear-like uniform bounds)."""
    def linear(k, fan_in, fan_out):
        kw, kb = jax.random.split(k)
        bound = 1.0 / jnp.sqrt(fan_in)
        # stored as (in, out) so kernels do x @ W + b
        w = jax.random.uniform(kw, (fan_in, fan_out), jnp.float32, -bound, bound)
        b = jax.random.uniform(kb, (1, fan_out), jnp.float32, -bound, bound)
        return w, b

    k1, k2, k3, k4 = jax.random.split(key, 4)
    w1, b1 = linear(k1, node_feature_dim, node_feature_dim)
    w2, b2 = linear(k2, node_feature_dim, node_feature_dim)
    wp, bp = linear(k3, node_feature_dim, action_space_dim)
    wv, bv = linear(k4, node_feature_dim, 1)
    return dict(w1=w1, b1=b1, w2=w2, b2=b2,
                w_policy=wp, b_policy=bp, w_value=wv, b_value=bv)


def _selu_ref(x):
    return SELU_SCALE * jnp.where(x > 0, x, SELU_ALPHA * (jnp.exp(x) - 1.0))


def _reference(node_features, params, nn_type):
    """Pure-JAX f32 reference matching the PyTorch module semantics."""
    hi = jax.lax.Precision.HIGHEST
    dot = lambda a, b: jnp.dot(a, b, precision=hi)
    x = node_features.sum(axis=1)
    h = _selu_ref(dot(x, params["w1"]) + params["b1"])
    h = _selu_ref(dot(h, params["w2"]) + params["b2"])
    if nn_type == "policy":
        return dot(h, params["w_policy"]) + params["b_policy"]
    return dot(h, params["w_value"]) + params["b_value"]


if __name__ == "__main__":
    B, N, D, A = 2, 8, 32, 16   # batch, nodes, node_feature_dim, action_space_dim

    key = jax.random.PRNGKey(0)
    k_nf, k_ef, k_adj, k_par = jax.random.split(key, 4)
    node_features = jax.random.normal(k_nf, (B, N, D), jnp.float32)
    # edge_features / adjacency_matrix are unused by BaselineMLP.forward,
    # constructed only to mirror the module signature.
    edge_features = jax.random.normal(k_ef, (B, N, N, 4), jnp.float32)
    adjacency_matrix = (jax.random.uniform(k_adj, (B, N, N)) > 0.5).astype(jnp.float32)

    params = init_params(k_par, D, A)
    kparams = prepare_kernel_params(params)

    # Fast path: review-recommended DEFAULT matmul precision.
    p_fast, v_fast = baseline_mlp_fused_forward(node_features, kparams, A)
    jax.block_until_ready((p_fast, v_fast))
    assert p_fast.shape == (B, A) and v_fast.shape == (B, 1)
    assert bool(jnp.all(jnp.isfinite(p_fast))) and bool(jnp.all(jnp.isfinite(v_fast)))

    # Validation path: f32-exact matmuls, checked against the pure-JAX reference.
    p_hi, v_hi = baseline_mlp_fused_forward(
        node_features, kparams, A, precision=jax.lax.Precision.HIGHEST)
    jax.block_until_ready((p_hi, v_hi))
    ref_p = _reference(node_features, params, "policy")
    ref_v = _reference(node_features, params, "value")
    assert jnp.allclose(p_hi, ref_p, atol=1e-4, rtol=1e-4)
    assert jnp.allclose(v_hi, ref_v, atol=1e-4, rtol=1e-4)

    # Optional bf16-input path (halves the dominant HBM read stream).
    p_bf, v_bf = baseline_mlp_fused_forward(
        node_features, kparams, A, input_dtype=jnp.bfloat16)
    jax.block_until_ready((p_bf, v_bf))
    assert p_bf.shape == (B, A) and v_bf.shape == (B, 1)
    assert bool(jnp.all(jnp.isfinite(p_bf))) and bool(jnp.all(jnp.isfinite(v_bf)))

    print("KERNEL_OK")
</pallas_src>

<mosaic_0001>
module attributes {stable_mosaic.version = 11 : i64} {
  func.func @kernel(%arg0: i32, %arg1: memref<8x8x32xf32, #tpu.memory_space<vmem>>, %arg2: memref<32x128xf32, #tpu.memory_space<vmem>>, %arg3: memref<1x128xf32, #tpu.memory_space<vmem>>, %arg4: memref<128x128xf32, #tpu.memory_space<vmem>>, %arg5: memref<1x128xf32, #tpu.memory_space<vmem>>, %arg6: memref<128x128xf32, #tpu.memory_space<vmem>>, %arg7: memref<1x128xf32, #tpu.memory_space<vmem>>, %arg8: memref<8x128xf32, #tpu.memory_space<vmem>>) attributes {dimension_semantics = [#tpu.dimension_semantics<parallel>], iteration_bounds = array<i64: 1>, scalar_prefetch = 0 : i64, scratch_operands = 0 : i64, tpu.core_type = #tpu.core_type<tc>, window_params = [{transform_indices = @transform_0, window_bounds = array<i64: 8, 8, 32>}, {pipeline_mode = #tpu.pipeline_mode<synchronous>, transform_indices = @transform_1, window_bounds = array<i64: 32, 128>}, {pipeline_mode = #tpu.pipeline_mode<synchronous>, transform_indices = @transform_2, window_bounds = array<i64: 1, 128>}, {pipeline_mode = #tpu.pipeline_mode<synchronous>, transform_indices = @transform_3, window_bounds = array<i64: 128, 128>}, {pipeline_mode = #tpu.pipeline_mode<synchronous>, transform_indices = @transform_4, window_bounds = array<i64: 1, 128>}, {pipeline_mode = #tpu.pipeline_mode<synchronous>, transform_indices = @transform_5, window_bounds = array<i64: 128, 128>}, {pipeline_mode = #tpu.pipeline_mode<synchronous>, transform_indices = @transform_6, window_bounds = array<i64: 1, 128>}, {transform_indices = @transform_7, window_bounds = array<i64: 8, 128>}]} {
    %c0 = arith.constant 0 : index
    %c0_0 = arith.constant 0 : index
    %c0_1 = arith.constant 0 : index
    %0 = vector.load %arg1[%c0, %c0_0, %c0_1] : memref<8x8x32xf32, #tpu.memory_space<vmem>>, vector<8x8x32xf32>
    %cst = arith.constant dense<0.000000e+00> : vector<8x32xf32>
    %1 = vector.multi_reduction <add>, %0, %cst [1] : vector<8x8x32xf32> to vector<8x32xf32>
    %c0_2 = arith.constant 0 : index
    %c0_3 = arith.constant 0 : index
    %2 = vector.load %arg2[%c0_2, %c0_3] : memref<32x128xf32, #tpu.memory_space<vmem>>, vector<32x128xf32>
    %cst_4 = arith.constant dense<0.000000e+00> : vector<8x128xf32>
    %3 = tpu.matmul %1, %2, %cst_4 {dimension_numbers = #tpu.dot_dimension_numbers<[1], [0], [0], [1], [0, 0, 1, 1], [], []>} : vector<8x32xf32>, vector<32x128xf32>, vector<8x128xf32> -> vector<8x128xf32>
    %c0_5 = arith.constant 0 : index
    %c0_6 = arith.constant 0 : index
    %4 = vector.load %arg3[%c0_5, %c0_6] : memref<1x128xf32, #tpu.memory_space<vmem>>, vector<1x128xf32>
    %5 = vector.broadcast %4 : vector<1x128xf32> to vector<8x128xf32>
    %6 = arith.addf %3, %5 : vector<8x128xf32>
    %cst_7 = arith.constant 0.000000e+00 : f32
    %7 = vector.broadcast %cst_7 : f32 to vector<8x128xf32>
    %8 = arith.cmpf ogt, %6, %7 : vector<8x128xf32>
    %9 = math.exp %6 : vector<8x128xf32>
    %cst_8 = arith.constant 1.000000e+00 : f32
    %10 = vector.broadcast %cst_8 : f32 to vector<8x128xf32>
    %11 = arith.subf %9, %10 : vector<8x128xf32>
    %cst_9 = arith.constant 1.67326319 : f32
    %12 = vector.broadcast %cst_9 : f32 to vector<8x128xf32>
    %13 = arith.mulf %12, %11 : vector<8x128xf32>
    %14 = arith.select %8, %6, %13 : vector<8x128xi1>, vector<8x128xf32>
    %c0_10 = arith.constant 0 : index
    %c0_11 = arith.constant 0 : index
    %15 = vector.load %arg4[%c0_10, %c0_11] : memref<128x128xf32, #tpu.memory_space<vmem>>, vector<128x128xf32>
    %cst_12 = arith.constant dense<0.000000e+00> : vector<8x128xf32>
    %16 = tpu.matmul %14, %15, %cst_12 {dimension_numbers = #tpu.dot_dimension_numbers<[1], [0], [0], [1], [0, 0, 1, 1], [], []>} : vector<8x128xf32>, vector<128x128xf32>, vector<8x128xf32> -> vector<8x128xf32>
    %c0_13 = arith.constant 0 : index
    %c0_14 = arith.constant 0 : index
    %17 = vector.load %arg5[%c0_13, %c0_14] : memref<1x128xf32, #tpu.memory_space<vmem>>, vector<1x128xf32>
    %18 = vector.broadcast %17 : vector<1x128xf32> to vector<8x128xf32>
    %19 = arith.addf %16, %18 : vector<8x128xf32>
    %cst_15 = arith.constant 0.000000e+00 : f32
    %20 = vector.broadcast %cst_15 : f32 to vector<8x128xf32>
    %21 = arith.cmpf ogt, %19, %20 : vector<8x128xf32>
    %22 = math.exp %19 : vector<8x128xf32>
    %cst_16 = arith.constant 1.000000e+00 : f32
    %23 = vector.broadcast %cst_16 : f32 to vector<8x128xf32>
    %24 = arith.subf %22, %23 : vector<8x128xf32>
    %cst_17 = arith.constant 1.67326319 : f32
    %25 = vector.broadcast %cst_17 : f32 to vector<8x128xf32>
    %26 = arith.mulf %25, %24 : vector<8x128xf32>
    %27 = arith.select %21, %19, %26 : vector<8x128xi1>, vector<8x128xf32>
    %c0_18 = arith.constant 0 : index
    %c0_19 = arith.constant 0 : index
    %28 = vector.load %arg6[%c0_18, %c0_19] : memref<128x128xf32, #tpu.memory_space<vmem>>, vector<128x128xf32>
    %cst_20 = arith.constant dense<0.000000e+00> : vector<8x128xf32>
    %29 = tpu.matmul %27, %28, %cst_20 {dimension_numbers = #tpu.dot_dimension_numbers<[1], [0], [0], [1], [0, 0, 1, 1], [], []>} : vector<8x128xf32>, vector<128x128xf32>, vector<8x128xf32> -> vector<8x128xf32>
    %c0_21 = arith.constant 0 : index
    %c0_22 = arith.constant 0 : index
    %30 = vector.load %arg7[%c0_21, %c0_22] : memref<1x128xf32, #tpu.memory_space<vmem>>, vector<1x128xf32>
    %31 = vector.broadcast %30 : vector<1x128xf32> to vector<8x128xf32>
    %32 = arith.addf %29, %31 : vector<8x128xf32>
    %c0_23 = arith.constant 0 : index
    %c0_24 = arith.constant 0 : index
    %33 = vector.load %arg8[%c0_23, %c0_24] : memref<8x128xf32, #tpu.memory_space<vmem>>, vector<8x128xf32>
    tpu.vector_store %arg8[%c0_23, %c0_24], %32 {strides = array<i32>} : memref<8x128xf32, #tpu.memory_space<vmem>>, vector<8x128xf32>,
    return
  }
  func.func @transform_0(%arg0: i32) -> (i32, i32, i32) {
    %c0_i32 = arith.constant 0 : i32
    %c0_i32_0 = arith.constant 0 : i32
    %c0_i32_1 = arith.constant 0 : i32
    return %arg0, %c0_i32, %c0_i32_0 : i32, i32, i32
  }
  func.func @transform_1(%arg0: i32) -> (i32, i32) {
    %c0_i32 = arith.constant 0 : i32
    %c0_i32_0 = arith.constant 0 : i32
    %c0_i32_1 = arith.constant 0 : i32
    return %c0_i32, %c0_i32_0 : i32, i32
  }
  func.func @transform_2(%arg0: i32) -> (i32, i32) {
    %c0_i32 = arith.constant 0 : i32
    %c0_i32_0 = arith.constant 0 : i32
    %c0_i32_1 = arith.constant 0 : i32
    return %c0_i32, %c0_i32_0 : i32, i32
  }
  func.func @transform_3(%arg0: i32) -> (i32, i32) {
    %c0_i32 = arith.constant 0 : i32
    %c0_i32_0 = arith.constant 0 : i32
    %c0_i32_1 = arith.constant 0 : i32
    return %c0_i32, %c0_i32_0 : i32, i32
  }
  func.func @transform_4(%arg0: i32) -> (i32, i32) {
    %c0_i32 = arith.constant 0 : i32
    %c0_i32_0 = arith.constant 0 : i32
    %c0_i32_1 = arith.constant 0 : i32
    return %c0_i32, %c0_i32_0 : i32, i32
  }
  func.func @transform_5(%arg0: i32) -> (i32, i32) {
    %c0_i32 = arith.constant 0 : i32
    %c0_i32_0 = arith.constant 0 : i32
    %c0_i32_1 = arith.constant 0 : i32
    return %c0_i32, %c0_i32_0 : i32, i32
  }
  func.func @transform_6(%arg0: i32) -> (i32, i32) {
    %c0_i32 = arith.constant 0 : i32
    %c0_i32_0 = arith.constant 0 : i32
    %c0_i32_1 = arith.constant 0 : i32
    return %c0_i32, %c0_i32_0 : i32, i32
  }
  func.func @transform_7(%arg0: i32) -> (i32, i32) {
    %c0_i32 = arith.constant 0 : i32
    %c0_i32_0 = arith.constant 0 : i32
    return %arg0, %c0_i32 : i32, i32
  }
}

</mosaic_0001>

<bundles_post_ra>
// kernel: tpu_custom_call.1
= control target key start
LH: loop header
LB: loop body
LE: loop exit
PB: predicated region body
PF: predicated region fallthrough
CT: control target
= control target key end

     0   :  { %12 = vsyncpa [#allocation3], 0  ;;  %s963_s0 = inlined_call_operand.hbm [shape: f32[8,8,32], index: 0, kind: input, shape index: {}]   ;;  %s964_s1 = inlined_call_operand.hbm [shape: f32[32,128], index: 1, kind: input, shape index: {}]   ;;  %s965_s2 = inlined_call_operand.vmem [shape: f32[1,128], index: 2, kind: input, shape index: {}]   ;;  %s966_s3 = inlined_call_operand.hbm [shape: f32[128,128], index: 3, kind: input, shape index: {}]   ;;  %s967_s4 = inlined_call_operand.vmem [shape: f32[1,128], index: 4, kind: input, shape index: {}]   ;;  %s968_s5 = inlined_call_operand.hbm [shape: f32[128,128], index: 5, kind: input, shape index: {}]   ;;  %s969_s6 = inlined_call_operand.vmem [shape: f32[1,128], index: 6, kind: input, shape index: {}]   ;;  %s970_s7 = inlined_call_operand.hbm [shape: f32[8,128], index: 7, kind: output, shape index: {}]  }
   0x1   :  { %13 = vsyncpa [#allocation6], 0 }
   0x2   :  { %14 = vsyncpa [#allocation9], 0 }
   0x3   :  { %15 = vsyncpa [#allocation4], 0  ;;  %s780_s24 = smov [#allocation5]   ;;  %s781_s26 = smov [#allocation2]  }
   0x4   :  { %s33_s25 = sshll.u32 %s780_s24, 4  ;;  %s21_s27 = sshll.u32 %s781_s26, 4  ;;  %s34_s25 = int_to_ptr.vmem [resolvable:$true] %s33_s25  ;;  %s830_s27 = int_to_ptr.vmem [resolvable:$true] %s21_s27 }
   0x5   :  { %s662_s30 = scalar_lea.hbm %s964_s1, 512 }
   0x6   :  { %p663_p0 = scmp.ne.s32.totalorder %s964_s1, %s662_s30  ;;  %p666_p1 = scmp.lt.u32.totalorder %s662_s30, %s964_s1 }
   0x8   :  { %p668_p2 = pnand %p666_p1, %p663_p0 }
   0xa   :  { %671 = shalt.err (!%p668_p2)
}
   0xb   :  { %s672_s12 = scalar_lea.vmem %s34_s25, 512  ;;  %p677_p4 = scmp.lt.s32.totalorder %s34_s25, %s34_s25 }
   0xc   :  { %p673_p3 = scmp.ne.s32.totalorder %s34_s25, %s672_s12  ;;  %p678_p5 = scmp.lt.s32.totalorder %s672_s12, %s672_s12 }
   0xe   :  { %p679_p6 = por %p678_p5, %p677_p4 }
  0x10   :  { %p680_p7 = pnand %p679_p6, %p673_p3 }
  0x12   :  { %683 = shalt.err (!%p680_p7)
}
  0x13   :  { %s782_s13 = smov 128   ;;  %s783_s14 = smov 8  }
  0x14   :  { %39 = dma.hbm_to_vmem [thread:$0]  %s964_s1, 512, %s34_s25, [#allocation6], %s782_s13, %s782_s13, %s783_s14  }
  0x15   :  { %s684_s19 = scalar_lea.hbm %s963_s0, 1024 }
  0x16   :  { %p685_p8 = scmp.ne.s32.totalorder %s963_s0, %s684_s19  ;;  %p688_p9 = scmp.lt.u32.totalorder %s684_s19, %s963_s0 }
  0x18   :  { %p690_p10 = pnand %p688_p9, %p685_p8 }
  0x1a   :  { %693 = shalt.err (!%p690_p10)
}
  0x1b   :  { %s694_s24 = scalar_lea.vmem %s830_s27, 1024  ;;  %p699_p12 = scmp.lt.s32.totalorder %s830_s27, %s830_s27 }
  0x1c   :  { %p695_p11 = scmp.ne.s32.totalorder %s830_s27, %s694_s24  ;;  %p700_p13 = scmp.lt.s32.totalorder %s694_s24, %s694_s24 }
  0x1e   :  { %p701_p0 = por %p700_p13, %p699_p12 }
  0x20   :  { %p702_p1 = pnand %p701_p0, %p695_p11 }
  0x22   :  { %705 = shalt.err (!%p702_p1)
}
  0x23   :  { %27 = dma.hbm_to_vmem [thread:$0]  %s963_s0, 1024, %s830_s27, [#allocation3], %s782_s13, %s782_s13, %s783_s14  }
  0x24   :  { %s784_s26 = smov [#allocation7]   ;;  %s785_s29 = smov [#allocation8]  }
  0x25   :  { %s47_s28 = sshll.u32 %s784_s26, 4  ;;  %s61_s30 = sshll.u32 %s785_s29, 4  ;;  %s48_s28 = int_to_ptr.vmem [resolvable:$true] %s47_s28  ;;  %s867_s30 = int_to_ptr.vmem [resolvable:$true] %s61_s30 }
  0x26   :  { %s706_s10 = scalar_lea.hbm %s966_s3, 2048 }
  0x27   :  { %p707_p2 = scmp.ne.s32.totalorder %s966_s3, %s706_s10  ;;  %p710_p3 = scmp.lt.u32.totalorder %s706_s10, %s966_s3 }
  0x29   :  { %p712_p4 = pnand %p710_p3, %p707_p2 }
  0x2b   :  { %715 = shalt.err (!%p712_p4)
}
  0x2c   :  { %s716_s0 = scalar_lea.vmem %s48_s28, 2048  ;;  %p721_p6 = scmp.lt.s32.totalorder %s48_s28, %s48_s28 }
  0x2d   :  { %p717_p5 = scmp.ne.s32.totalorder %s48_s28, %s716_s0  ;;  %p722_p7 = scmp.lt.s32.totalorder %s716_s0, %s716_s0 }
  0x2f   :  { %p723_p8 = por %p722_p7, %p721_p6 }
  0x31   :  { %p724_p9 = pnand %p723_p8, %p717_p5 }
  0x33   :  { %727 = shalt.err (!%p724_p9)
}
  0x34   :  { %53 = dma.hbm_to_vmem [thread:$0]  %s966_s3, 2048, %s48_s28, [#allocation6], %s782_s13, %s782_s13, %s783_s14  }
  0x35   :  { %s728_s20 = scalar_lea.hbm %s968_s5, 2048 }
  0x36   :  { %p729_p10 = scmp.ne.s32.totalorder %s968_s5, %s728_s20  ;;  %p732_p11 = scmp.lt.u32.totalorder %s728_s20, %s968_s5 }
  0x38   :  { %p734_p12 = pnand %p732_p11, %p729_p10 }
  0x3a   :  { %737 = shalt.err (!%p734_p12)
}
  0x3b   :  { %s738_s1 = scalar_lea.vmem %s867_s30, 2048  ;;  %p743_p0 = scmp.lt.s32.totalorder %s867_s30, %s867_s30 }
  0x3c   :  { %p739_p13 = scmp.ne.s32.totalorder %s867_s30, %s738_s1  ;;  %p744_p1 = scmp.lt.s32.totalorder %s738_s1, %s738_s1 }
  0x3e   :  { %p745_p2 = por %p744_p1, %p743_p0 }
  0x40   :  { %p746_p3 = pnand %p745_p2, %p739_p13 }
  0x42   :  { %749 = shalt.err (!%p746_p3)
}
  0x43   :  { %67 = dma.hbm_to_vmem [thread:$0]  %s968_s5, 2048, %s867_s30, [#allocation9], %s782_s13, %s782_s13, %s783_s14  }
  0x44   :  { %772 = dma.done.wait [#allocation3], 1024  }
  0x45   :  { %773 = vsyncadd [#allocation3], 4294966272 }
  0x46   :  { %774 = dma.done.wait [#allocation6], 2560  }
  0x47   :  { %775 = vsyncadd [#allocation6], 4294964736 }
  0x48   :  { %776 = dma.done.wait [#allocation9], 2048  }
  0x49   :  { %777 = vsyncadd [#allocation9], 4294965248  ;;  %v786_v0 = vmov 0.0|0.0   ;;  %vm787_vm0 = vmmov 0   ;;  %v788_v1 = vmov 0.0   ;;  %vm90_vm1 = vcmask 261120  }
  0x4a   :  { %594 = vmatprep.subr.bf16.mxu0 %v786_v0  ;;  %521 = vmatprep.mubr.msk.f32.mxu0 %vm787_vm0, %v788_v1  ;;  %v147_v2 = vld [vmem:[#allocation5] sm:$0xff]  ;;  %v148_v3 = vld [vmem:[#allocation5 + $0x8] sm:$0xff]  ;;  %v149_v4 = vld [vmem:[#allocation5 + $0x10] sm:$0xff]  ;;  %vm166_vm2 = vcmask 1041409   ;;  %vm168_vm3 = vcmask 1042434   ;;  %vm170_vm4 = vcmask 1043459  }
  0x4b   :  { %600 = vmatprep.subr.bf16.mxu1 %v786_v0  ;;  %556 = vmatprep.mubr.msk.f32.mxu1 %vm787_vm0, %v788_v1  ;;  %v595_v5 = vpack.c.bf16 %v148_v3, %v147_v2  ;;  %v150_v6 = vld [vmem:[#allocation5 + $0x18] sm:$0xff]  ;;  %v82_v7 = vld [vmem:[#allocation2] sm:$0xff]  ;;  %v83_v8 = vld [vmem:[#allocation2 + $0x8] sm:$0xff]  ;;  %vm172_vm5 = vcmask 1044484   ;;  %vm174_vm6 = vcmask 1045509   ;;  %vm176_vm7 = vcmask 1046534  }
  0x4c   :  { %v84_v9 = vld [vmem:[#allocation2 + $0x10] sm:$0xff]  ;;  %v85_v10 = vld [vmem:[#allocation2 + $0x18] sm:$0xff]  ;;  %v86_v11 = vld [vmem:[#allocation2 + $0x20] sm:$0xff]  ;;  %v91_v12 = vsel %vm90_vm1, %v82_v7, 0.0  ;;  %v98_v13 = vsel %vm90_vm1, %v83_v8, 0.0  ;;  %v598_v14 = vpack.c.bf16 %v150_v6, %v149_v4  ;;  %vm178_vm8 = vcmask 1047559  }
  0x4d   :  { %596 = vmatpush3.bf16.msra.mxu0 %v595_v5  ;;  %v87_v15 = vld [vmem:[#allocation2 + $0x28] sm:$0xff]  ;;  %v88_v16 = vld [vmem:[#allocation2 + $0x30] sm:$0xff]  ;;  %v89_v17 = vld [vmem:[#allocation2 + $0x38] sm:$0xff]  ;;  %v92_v18 = vrot.slane %v91_v12, 4  ;;  %v99_v19 = vrot.slane %v98_v13, 4  ;;  %v105_v20 = vsel %vm90_vm1, %v84_v9, 0.0 }
  0x4e   :  { %597 = vmatprep.subr.bf16.mxu0 %v786_v0  ;;  %v106_v21 = vrot.slane %v105_v20, 4  ;;  %v112_v22 = vsel %vm90_vm1, %v85_v10, 0.0  ;;  %v119_v23 = vsel %vm90_vm1, %v86_v11, 0.0  ;;  %v126_v24 = vsel %vm90_vm1, %v87_v15, 0.0  ;;  %v258_v57 = vld [vmem:[#allocation7] sm:$0xff]  ;;  %v259_v58 = vld [vmem:[#allocation7 + $0x8] sm:$0xff] }
  0x4f   :  { %v93_v25 = vadd.f32 %v92_v18, %v91_v12  ;;  %v100_v26 = vadd.f32 %v99_v19, %v98_v13  ;;  %v113_v27 = vrot.slane %v112_v22, 4  ;;  %v120_v28 = vrot.slane %v119_v23, 4  ;;  %v260_v5 = vld [vmem:[#allocation7 + $0x10] sm:$0xff]  ;;  %v261_v6 = vld [vmem:[#allocation7 + $0x18] sm:$0xff]  ;;  %s789_s29 = smov [#allocation10]  }
  0x50   :  { %v107_v29 = vadd.f32 %v106_v21, %v105_v20  ;;  %v127_v30 = vrot.slane %v126_v24, 4  ;;  %v133_v31 = vsel %vm90_vm1, %v88_v16, 0.0  ;;  %v140_v32 = vsel %vm90_vm1, %v89_v17, 0.0  ;;  %v262_v20 = vld [vmem:[#allocation7 + $0x20] sm:$0xff]  ;;  %v263_v21 = vld [vmem:[#allocation7 + $0x28] sm:$0xff]  ;;  %s457_s30 = sshll.u32 %s789_s29, 4  ;;  %s458_s30 = int_to_ptr.vmem [resolvable:$true] %s457_s30 }
  0x51   :  { %599 = vmatpush3.bf16.msra.mxu0 %v598_v14  ;;  %v94_v33 = vrot.slane %v93_v25, 2  ;;  %v101_v34 = vrot.slane %v100_v26, 2  ;;  %v114_v35 = vadd.f32 %v113_v27, %v112_v22  ;;  %v121_v36 = vadd.f32 %v120_v28, %v119_v23  ;;  %v265_v27 = vld [vmem:[#allocation7 + $0x38] sm:$0xff]  ;;  %p755_p5 = scmp.lt.s32.totalorder %s458_s30, %s458_s30 }
  0x52   :  { %v108_v37 = vrot.slane %v107_v29, 2  ;;  %v128_v38 = vadd.f32 %v127_v30, %v126_v24  ;;  %v134_v39 = vrot.slane %v133_v31, 4  ;;  %v141_v40 = vrot.slane %v140_v32, 4  ;;  %624 = vmatprep.subr.bf16.mxu0 %v786_v0  ;;  %v267_v30 = vld [vmem:[#allocation7 + $0x48] sm:$0xff] }
  0x53   :  { %v95_v41 = vadd.f32 %v94_v33, %v93_v25  ;;  %v102_v42 = vadd.f32 %v101_v34, %v100_v26  ;;  %v115_v43 = vrot.slane %v114_v35, 2  ;;  %v122_v44 = vrot.slane %v121_v36, 2  ;;  %v264_v26 = vld [vmem:[#allocation7 + $0x30] sm:$0xff]  ;;  %v269_v33 = vld [vmem:[#allocation7 + $0x58] sm:$0xff] }
  0x54   :  { %v109_v45 = vadd.f32 %v108_v37, %v107_v29  ;;  %v129_v46 = vrot.slane %v128_v38, 2  ;;  %v135_v47 = vadd.f32 %v134_v39, %v133_v31  ;;  %v142_v48 = vadd.f32 %v141_v40, %v140_v32  ;;  %v266_v29 = vld [vmem:[#allocation7 + $0x40] sm:$0xff]  ;;  %v268_v32 = vld [vmem:[#allocation7 + $0x50] sm:$0xff] }
  0x55   :  { %v96_v49 = vrot.slane %v95_v41, 1  ;;  %v103_v50 = vrot.slane %v102_v42, 1  ;;  %v116_v51 = vadd.f32 %v115_v43, %v114_v35  ;;  %v123_v52 = vadd.f32 %v122_v44, %v121_v36  ;;  %v270_v35 = vld [vmem:[#allocation7 + $0x60] sm:$0xff]  ;;  %v272_v37 = vld [vmem:[#allocation7 + $0x70] sm:$0xff]  ;;  %v360_v44 = vld [vmem:[#allocation8 + $0x18] sm:$0xff] }
  0x56   :  { %v110_v53 = vrot.slane %v109_v45, 1  ;;  %v130_v54 = vadd.f32 %v129_v46, %v128_v38  ;;  %v136_v55 = vrot.slane %v135_v47, 2  ;;  %v143_v56 = vrot.slane %v142_v48, 2  ;;  %v273_v38 = vld [vmem:[#allocation7 + $0x78] sm:$0xff]  ;;  %v357_v40 = vld [vmem:[#allocation8] sm:$0xff] }
  0x57   :  { %v97_v59 = vadd.f32 %v96_v49, %v95_v41  ;;  %v104_v60 = vadd.f32 %v103_v50, %v102_v42  ;;  %v117_v61 = vrot.slane %v116_v51, 1  ;;  %v124_v62 = vrot.slane %v123_v52, 1  ;;  %v358_v41 = vld [vmem:[#allocation8 + $0x8] sm:$0xff]  ;;  %v359_v42 = vld [vmem:[#allocation8 + $0x10] sm:$0xff]  ;;  %v361_v46 = vld [vmem:[#allocation8 + $0x20] sm:$0xff] }
  0x58   :  { %v111_v63 = vadd.f32 %v110_v53, %v109_v45  ;;  %v131_v2 = vrot.slane %v130_v54, 1  ;;  %v137_v3 = vadd.f32 %v136_v55, %v135_v47  ;;  %v144_v4 = vadd.f32 %v143_v56, %v142_v48  ;;  %v362_v47 = vld [vmem:[#allocation8 + $0x28] sm:$0xff]  ;;  %v468_v49 = vld [vmem:[%s965_s2] ss:$0 sm:$0xff] }
  0x59   :  { %v118_v7 = vadd.f32 %v117_v61, %v116_v51  ;;  %v125_v8 = vadd.f32 %v124_v62, %v123_v52  ;;  %v167_v9 = vsel %vm166_vm2, %v104_v60, %v97_v59  ;;  %v601_v10 = vpack.c.bf16 %v259_v58, %v258_v57  ;;  %v363_v58 = vld [vmem:[#allocation8 + $0x30] sm:$0xff]  ;;  %v364_v59 = vld [vmem:[#allocation8 + $0x38] sm:$0xff]  ;;  %v365_v61 = vld [vmem:[#allocation8 + $0x40] sm:$0xff] }
  0x5a   :  { %v132_v11 = vadd.f32 %v131_v2, %v130_v54  ;;  %v138_v12 = vrot.slane %v137_v3, 1  ;;  %v145_v13 = vrot.slane %v144_v4, 1  ;;  %v169_v14 = vsel %vm168_vm3, %v111_v63, %v167_v9  ;;  %v366_v62 = vld [vmem:[#allocation8 + $0x48] sm:$0xff]  ;;  %v367_v2 = vld [vmem:[#allocation8 + $0x50] sm:$0xff]  ;;  %v372_v9 = vld [vmem:[#allocation8 + $0x78] sm:$0xff] }
  0x5b   :  { %v171_v15 = vsel %vm170_vm4, %v118_v7, %v169_v14  ;;  %602 = vmatpush3.bf16.msra.mxu1 %v601_v10  ;;  %v604_v16 = vpack.c.bf16 %v261_v6, %v260_v5  ;;  %v607_v25 = vpack.c.bf16 %v263_v21, %v262_v20  ;;  %v610_v28 = vpack.c.bf16 %v265_v27, %v264_v26  ;;  %v369_v5 = vld [vmem:[#allocation8 + $0x60] sm:$0xff]  ;;  %v370_v6 = vld [vmem:[#allocation8 + $0x68] sm:$0xff] }
  0x5c   :  { %v139_v17 = vadd.f32 %v138_v12, %v137_v3  ;;  %v146_v18 = vadd.f32 %v145_v13, %v144_v4  ;;  %v173_v19 = vsel %vm172_vm5, %v125_v8, %v171_v15  ;;  %603 = vmatprep.subr.bf16.mxu1 %v786_v0  ;;  %v613_v31 = vpack.c.bf16 %v267_v30, %v266_v29  ;;  %v368_v3 = vld [vmem:[#allocation8 + $0x58] sm:$0xff]  ;;  %v371_v8 = vld [vmem:[#allocation8 + $0x70] sm:$0xff] }
  0x5d   :  { %v175_v22 = vsel %vm174_vm6, %v132_v11, %v173_v19  ;;  %v616_v34 = vpack.c.bf16 %v269_v33, %v268_v32  ;;  %v622_v39 = vpack.c.bf16 %v273_v38, %v272_v37  ;;  %v625_v43 = vpack.c.bf16 %v358_v41, %v357_v40  ;;  %v471_v11 = vld [vmem:[%s967_s4] ss:$0 sm:$0xff]  ;;  %s750_s4 = scalar_lea.vmem %s458_s30, 128 }
  0x5e   :  { %v177_v23 = vsel %vm176_vm7, %v139_v17, %v175_v22  ;;  %v628_v45 = vpack.c.bf16 %v360_v44, %v359_v42  ;;  %v631_v48 = vpack.c.bf16 %v362_v47, %v361_v46  ;;  %v634_v60 = vpack.c.bf16 %v364_v59, %v363_v58  ;;  %p751_p4 = scmp.ne.s32.totalorder %s458_s30, %s750_s4  ;;  %p756_p6 = scmp.lt.s32.totalorder %s750_s4, %s750_s4 }
  0x5f   :  { %v179_v24 = vsel %vm178_vm8, %v146_v18, %v177_v23  ;;  %605 = vmatpush3.bf16.msra.mxu1 %v604_v16  ;;  %v637_v63 = vpack.c.bf16 %v366_v62, %v365_v61  ;;  %v640_v4 = vpack.c.bf16 %v368_v3, %v367_v2  ;;  %v643_v7 = vpack.c.bf16 %v370_v6, %v369_v5 }
  0x60   :  { %522 = vmatmul.mubr.msk.f32.vlgmr.msra.gmra.mrb[0].mxu0 %vm90_vm1, %v179_v24  ;;  %606 = vmatprep.subr.bf16.mxu1 %v786_v0  ;;  %v646_v10 = vpack.c.bf16 %v372_v9, %v371_v8  ;;  %p757_p7 = por %p756_p6, %p755_p5 }
  0x61   :  { %591 = vmatprep.mubr.msk.f32.mxu0 %vm787_vm0, %v788_v1  ;;  %v271_v1 = vld [vmem:[#allocation7 + $0x68] sm:$0xff]  ;;  %626 = vmatpush3.bf16.msra.mxu0 %v625_v43 }
  0x62   :  { %v619_v36 = vpack.c.bf16 %v271_v1, %v270_v35  ;;  %627 = vmatprep.subr.bf16.mxu0 %v786_v0  ;;  %p758_p8 = pnand %p757_p7, %p751_p4 }
  0x63   :  { %608 = vmatpush3.bf16.msra.mxu1 %v607_v25 }
  0x64   :  { %609 = vmatprep.subr.bf16.mxu1 %v786_v0 }
  0x65   :  { %629 = vmatpush3.bf16.msra.mxu0 %v628_v45 }
  0x66   :  { %630 = vmatprep.subr.bf16.mxu0 %v786_v0 }
  0x67   :  { %611 = vmatpush3.bf16.msra.mxu1 %v610_v28 }
  0x68   :  { %612 = vmatprep.subr.bf16.mxu1 %v786_v0 }
  0x69   :  { %632 = vmatpush3.bf16.msra.mxu0 %v631_v48 }
  0x6a   :  { %633 = vmatprep.subr.bf16.mxu0 %v786_v0 }
  0x6b   :  { %614 = vmatpush3.bf16.msra.mxu1 %v613_v31 }
  0x6c   :  { %615 = vmatprep.subr.bf16.mxu1 %v786_v0 }
  0x6d   :  { %635 = vmatpush3.bf16.msra.mxu0 %v634_v60 }
  0x6e   :  { %636 = vmatprep.subr.bf16.mxu0 %v786_v0 }
  0x6f   :  { %617 = vmatpush3.bf16.msra.mxu1 %v616_v34 }
  0x70   :  { %618 = vmatprep.subr.bf16.mxu1 %v786_v0 }
  0x71   :  { %638 = vmatpush3.bf16.msra.mxu0 %v637_v63 }
  0x72   :  { %639 = vmatprep.subr.bf16.mxu0 %v786_v0 }
  0x73   :  { %620 = vmatpush3.bf16.msra.mxu1 %v619_v36 }
  0x74   :  { %621 = vmatprep.subr.bf16.mxu1 %v786_v0 }
  0x75   :  { %641 = vmatpush3.bf16.msra.mxu0 %v640_v4 }
  0x76   :  { %642 = vmatprep.subr.bf16.mxu0 %v786_v0 }
  0x77   :  { %623 = vmatpush3.bf16.msra.mxu1 %v622_v39 }
  0x79   :  { %644 = vmatpush3.bf16.msra.mxu0 %v643_v7 }
  0x7a   :  { %645 = vmatprep.subr.bf16.mxu0 %v786_v0  ;;  %v473_v0 = vld [vmem:[%s969_s6] ss:$0 sm:$0xff] }
  0x7d   :  { %647 = vmatpush3.bf16.msra.mxu0 %v646_v10 }
 0x133   :  { %v248_v50 = vpop.f32.mrb[0].mxu0 }
 0x134   :  { %v249_v51 = vadd.f32 %v468_v49, %v248_v50  ;;  %v523_v52 = vpop.f32.mrb[1].mxu0 }
 0x136   :  { %v253_v53 = vmul.f32 1.442695, %v249_v51  ;;  %vm252_vm9 = vcmp.gt.f32.partialorder %v249_v51, 0.0 }
 0x138   :  { %658 = vpow2.f32 %v253_v53 }
 0x142   :  { %v659_v54 = vpop.eup %658 }
 0x143   :  { %v470_v55 = vadd.f32 -1.0, %v659_v54 }
 0x145   :  { %v256_v56 = vmul.f32 1.6732632, %v470_v55 }
 0x147   :  { %v257_v57 = vsel %vm252_vm9, %v249_v51, %v256_v56 }
 0x148   :  { %557 = vmatmul.mubr.f32.vlgmr.msra.gmra.mrb[0].mxu1 %v257_v57 }
 0x21b   :  { %v347_v12 = vpop.f32.mrb[0].mxu1 }
 0x21c   :  { %v348_v13 = vadd.f32 %v471_v11, %v347_v12  ;;  %v558_v14 = vpop.f32.mrb[1].mxu1 }
 0x21e   :  { %v352_v15 = vmul.f32 1.442695, %v348_v13  ;;  %vm351_vm10 = vcmp.gt.f32.partialorder %v348_v13, 0.0 }
 0x220   :  { %660 = vpow2.f32 %v352_v15 }
 0x22a   :  { %v661_v16 = vpop.eup %660 }
 0x22b   :  { %v472_v17 = vadd.f32 -1.0, %v661_v16 }
 0x22d   :  { %v355_v18 = vmul.f32 1.6732632, %v472_v17 }
 0x22f   :  { %v356_v19 = vsel %vm351_vm10, %v348_v13, %v355_v18 }
 0x230   :  { %592 = vmatmul.mubr.f32.vlgmr.msra.gmra.mrb[2].mxu0 %v356_v19 }
 0x303   :  { %v446_v20 = vpop.f32.mrb[2].mxu0 }
 0x304   :  { %v447_v21 = vadd.f32 %v473_v0, %v446_v20  ;;  %v593_v22 = vpop.f32.mrb[3].mxu0 }
 0x306   :  { %450 = vst [vmem:[#allocation10] sm:$0xff] %v447_v21 }
 0x307   :  { %761 = shalt.err (!%p758_p8)
}
 0x308   :  { %s762_s10 = scalar_lea.hbm %s970_s7, 128 }
 0x309   :  { %p763_p9 = scmp.ne.s32.totalorder %s970_s7, %s762_s10  ;;  %p766_p10 = scmp.lt.u32.totalorder %s762_s10, %s970_s7 }
 0x30b   :  { %p768_p11 = pnand %p766_p10, %p763_p9 }
 0x30d   :  { %771 = shalt.err (!%p768_p11)
}
 0x30e   :  { %460 = dma.vmem_to_hbm [thread:$0]  %s458_s30, 128, %s970_s7, [#allocation4]  }
 0x30f   :  { %778 = dma.done.wait [#allocation4], 128  }
 0x310   :  { %779 = vsyncadd [#allocation4], 4294967168 }
 0x311   :  { %464 = vsyncpa [#allocation3], 1 }
 0x312   :  { %465 = vsyncpa [#allocation6], 1 }
 0x313   :  { %466 = vsyncpa [#allocation9], 1 }
 0x314   :  { %467 = vsyncpa [#allocation4], 1 }

</bundles_post_ra>
